<compile_context>
chip_gen: v7x
topology: tpu7x:2x2x1
jax: 0.10.0
libtpu: 0.0.40
codegen_flags: <defaults>
</compile_context>

<pallas_src>
import numpy as np
import jax
import jax.numpy as jnp
from jax.experimental import pallas as pl
from jax.experimental.pallas import tpu as pltpu


def build_pool_matrix(H: int, W: int) -> np.ndarray:
    """Rows = the 21 adaptive-avg-pool windows (4x4, 2x2, 1x1) over flattened HW."""
    rows = []
    for k in (4, 2, 1):                       # cat order: out4x4, out2x2, out1x1
        for oy in range(k):
            y0 = (oy * H) // k
            y1 = -(-((oy + 1) * H) // k)      # ceil
            for ox in range(k):
                x0 = (ox * W) // k
                x1 = -(-((ox + 1) * W) // k)
                m = np.zeros((H, W), np.float32)
                m[y0:y1, x0:x1] = 1.0 / float((y1 - y0) * (x1 - x0))
                rows.append(m.reshape(H * W))
    return np.stack(rows, axis=0)             # (21, HW)


def fold_spp_params(pool_T, conv_w, gamma, beta, mean, var, eps, w1, w2):
    """Fold pooling + depthwise Conv1d taps + eval-BN into kernel constants.

    Returns:
      m       : (C, HW)      M[c,s] = bn_scale[c] * sum_j pool_T[j,s] * conv_w[c,0,j]
      shift   : (C, 1)       eval-BN additive term (beta - mean * scale)
      w_stack : (2, C, mip)  [0] = W1^T (C, mip), [1] = W2 (C, mip)
    """
    scale = gamma / jnp.sqrt(var + eps)                   # (C,)
    shift = (beta - mean * scale)[:, None]                # (C, 1)
    taps = conv_w[:, 0, :] * scale[:, None]               # (C, 21)
    m = taps @ pool_T                                     # (C, HW)
    w_stack = jnp.stack([w1.T, w2], axis=0)               # (2, C, mip)
    return m, shift, w_stack


def spp_gate_kernel(x_ref, m_ref, shift_ref, w_ref, gate_ref):
    # x_ref    : (B, C, HW)  NCHW-flattened input (C on sublanes, HW on lanes)
    # m_ref    : (C, HW)     folded pooling * conv taps * bn_scale weight
    # shift_ref: (C, 1)      folded bn shift
    # w_ref    : (2, C, mip) [0] = W1^T, [1] = W2
    # gate_ref : (B, C, 1)   per-channel sigmoid gate
    x = x_ref[...]
    m = m_ref[...]

    # SPPFusion (pooling + depthwise conv + BN scale) as one multiply-reduce.
    spp = jnp.sum(x * m, axis=-1, keepdims=True)                     # (B, C, 1)
    y = jnp.maximum(spp + shift_ref[...], 0.0)                       # (B, C, 1)

    # SE MLP on VPU/XLU (C, mip are tiny; no point pushing M=B rows to MXU).
    w1t = w_ref[0]                                                   # (C, mip)
    w2 = w_ref[1]                                                    # (C, mip)
    h = jnp.maximum(jnp.sum(y * w1t, axis=1, keepdims=True), 0.0)    # (B, 1, mip)
    att = jnp.sum(h * w2, axis=-1, keepdims=True)                    # (B, C, 1)
    gate_ref[...] = jax.nn.sigmoid(att)                              # EUP


def spp_attention_block(x_nchw, m, shift, w_stack):
    B, C, H, W = x_nchw.shape
    HW = H * W
    mip = w_stack.shape[-1]

    # NCHW -> (B, C, HW): contiguous reshape, no transpose / data movement.
    x_flat = x_nchw.reshape(B, C, HW)

    # Whole problem is a single grid step: x block (B*C*HW*4 ~ 64 KiB at test
    # shapes) plus constants fits trivially in VMEM on v5e/v6e/v7x.  If C*HW
    # ever scales toward the v7x 32 MiB scoped default, tile the batch / HW
    # axes and set pltpu.CompilerParams(vmem_limit_bytes=...).
    gate = pl.pallas_call(
        spp_gate_kernel,
        out_shape=jax.ShapeDtypeStruct((B, C, 1), jnp.float32),
        grid=(1,),
        in_specs=[
            pl.BlockSpec((B, C, HW), lambda i: (0, 0, 0)),    # x (NCHW-flattened)
            pl.BlockSpec((C, HW), lambda i: (0, 0)),          # folded M
            pl.BlockSpec((C, 1), lambda i: (0, 0)),           # bn shift
            pl.BlockSpec((2, C, mip), lambda i: (0, 0, 0)),   # W1^T / W2
        ],
        out_specs=pl.BlockSpec((B, C, 1), lambda i: (0, 0, 0)),
        compiler_params=pltpu.CompilerParams(
            dimension_semantics=("arbitrary",)),
    )(x_flat, m, shift, w_stack)

    # expand_as(x): leave the spatial broadcast to XLA (fuses into consumers;
    # avoids writing HW identical copies of the gate from the kernel).
    return jnp.broadcast_to(gate.reshape(B, C, 1, 1), (B, C, H, W))


def reference(x_nchw, pool_T, conv_w, gamma, beta, mean, var, eps, w1, w2):
    """Pure-JAX mirror of the PyTorch module (eval mode), unfolded math."""
    B, C, H, W = x_nchw.shape
    xf = x_nchw.reshape(B, C, H * W).astype(jnp.float32)
    pooled = jnp.einsum("bcs,js->bcj", xf, pool_T)              # pool + concat (B,C,21)
    spp = jnp.sum(pooled * conv_w[:, 0, :][None], axis=-1)      # depthwise Conv1d (B,C)
    y = (spp - mean) * (gamma / jnp.sqrt(var + eps)) + beta     # BatchNorm1d (eval)
    y = jnp.maximum(y, 0.0)                                     # ReLU
    h = jnp.maximum(y @ w1.T, 0.0)                              # Linear + ReLU
    att = jax.nn.sigmoid(h @ w2.T)                              # Linear + Sigmoid
    return jnp.broadcast_to(att[:, :, None, None], x_nchw.shape)


if __name__ == "__main__":
    B, C, H, W = 2, 32, 16, 16
    reduction_rate = 16
    mip = max(4, C // reduction_rate)
    HW = H * W

    key = jax.random.PRNGKey(0)
    kx, kdw, kw1, kw2 = jax.random.split(key, 4)

    x = jax.random.normal(kx, (B, C, H, W), dtype=jnp.float32)

    # Parameters (deterministic, shapes from the PyTorch __init__).
    conv_w = jax.random.normal(kdw, (C, 1, 21), dtype=jnp.float32) * 0.1  # Conv1d weight
    w1 = jax.random.normal(kw1, (mip, C), dtype=jnp.float32) * 0.1        # Linear(C, mip)
    w2 = jax.random.normal(kw2, (C, mip), dtype=jnp.float32) * 0.1        # Linear(mip, C)

    # BatchNorm1d in eval mode with fresh init: gamma=1, beta=0, mean=0, var=1.
    # TODO(synk): training-mode BN (batch statistics) not modeled; eval semantics used.
    eps = 1e-5
    gamma = jnp.ones((C,), jnp.float32)
    beta = jnp.zeros((C,), jnp.float32)
    running_mean = jnp.zeros((C,), jnp.float32)
    running_var = jnp.ones((C,), jnp.float32)

    pool_T = jnp.asarray(build_pool_matrix(H, W))                          # (21, HW)

    m, shift, w_stack = fold_spp_params(
        pool_T, conv_w, gamma, beta, running_mean, running_var, eps, w1, w2)

    out = jax.block_until_ready(spp_attention_block(x, m, shift, w_stack))

    ref = jax.block_until_ready(
        reference(x, pool_T, conv_w, gamma, beta, running_mean,
                  running_var, eps, w1, w2))

    assert out.shape == (B, C, H, W), out.shape
    np.testing.assert_allclose(np.asarray(out), np.asarray(ref),
                               rtol=1e-5, atol=1e-5)
    print("KERNEL_OK")
</pallas_src>

<mosaic_0001>
module attributes {stable_mosaic.version = 11 : i64} {
  func.func @spp_gate_kernel(%arg0: i32, %arg1: memref<2x32x256xf32, #tpu.memory_space<vmem>>, %arg2: memref<32x256xf32, #tpu.memory_space<vmem>>, %arg3: memref<32x1xf32, #tpu.memory_space<vmem>>, %arg4: memref<2x32x4xf32, #tpu.memory_space<vmem>>, %arg5: memref<2x32x1xf32, #tpu.memory_space<vmem>>) attributes {dimension_semantics = [#tpu.dimension_semantics<arbitrary>], iteration_bounds = array<i64: 1>, scalar_prefetch = 0 : i64, scratch_operands = 0 : i64, tpu.core_type = #tpu.core_type<tc>, window_params = [{pipeline_mode = #tpu.pipeline_mode<synchronous>, transform_indices = @transform_0, window_bounds = array<i64: 2, 32, 256>}, {pipeline_mode = #tpu.pipeline_mode<synchronous>, transform_indices = @transform_1, window_bounds = array<i64: 32, 256>}, {pipeline_mode = #tpu.pipeline_mode<synchronous>, transform_indices = @transform_2, window_bounds = array<i64: 32, 1>}, {pipeline_mode = #tpu.pipeline_mode<synchronous>, transform_indices = @transform_3, window_bounds = array<i64: 2, 32, 4>}, {pipeline_mode = #tpu.pipeline_mode<synchronous>, transform_indices = @transform_4, window_bounds = array<i64: 2, 32, 1>}]} {
    %c0 = arith.constant 0 : index
    %c0_0 = arith.constant 0 : index
    %c0_1 = arith.constant 0 : index
    %0 = vector.load %arg1[%c0, %c0_0, %c0_1] : memref<2x32x256xf32, #tpu.memory_space<vmem>>, vector<2x32x256xf32>
    %c0_2 = arith.constant 0 : index
    %c0_3 = arith.constant 0 : index
    %1 = vector.load %arg2[%c0_2, %c0_3] : memref<32x256xf32, #tpu.memory_space<vmem>>, vector<32x256xf32>
    %2 = vector.shape_cast %1 : vector<32x256xf32> to vector<1x32x256xf32>
    %3 = vector.broadcast %2 : vector<1x32x256xf32> to vector<2x32x256xf32>
    %4 = arith.mulf %0, %3 : vector<2x32x256xf32>
    %cst = arith.constant dense<0.000000e+00> : vector<2x32xf32>
    %5 = vector.multi_reduction <add>, %4, %cst [2] : vector<2x32x256xf32> to vector<2x32xf32>
    %6 = vector.shape_cast %5 : vector<2x32xf32> to vector<2x32x1xf32>
    %c0_4 = arith.constant 0 : index
    %c0_5 = arith.constant 0 : index
    %7 = vector.load %arg3[%c0_4, %c0_5] : memref<32x1xf32, #tpu.memory_space<vmem>>, vector<32x1xf32>
    %8 = vector.shape_cast %7 : vector<32x1xf32> to vector<1x32x1xf32>
    %9 = vector.broadcast %8 : vector<1x32x1xf32> to vector<2x32x1xf32>
    %10 = arith.addf %6, %9 : vector<2x32x1xf32>
    %cst_6 = arith.constant 0.000000e+00 : f32
    %11 = vector.broadcast %cst_6 : f32 to vector<2x32x1xf32>
    %12 = arith.maximumf %10, %11 : vector<2x32x1xf32>
    %c0_7 = arith.constant 0 : index
    %c0_8 = arith.constant 0 : index
    %c0_9 = arith.constant 0 : index
    %13 = vector.load %arg4[%c0_7, %c0_8, %c0_9] : memref<2x32x4xf32, #tpu.memory_space<vmem>>, vector<1x32x4xf32>
    %14 = vector.shape_cast %13 : vector<1x32x4xf32> to vector<32x4xf32>
    %c1 = arith.constant 1 : index
    %c0_10 = arith.constant 0 : index
    %c0_11 = arith.constant 0 : index
    %15 = vector.load %arg4[%c1, %c0_10, %c0_11] : memref<2x32x4xf32, #tpu.memory_space<vmem>>, vector<1x32x4xf32>
    %16 = vector.shape_cast %15 : vector<1x32x4xf32> to vector<32x4xf32>
    %17 = vector.shape_cast %14 : vector<32x4xf32> to vector<1x32x4xf32>
    %18 = vector.broadcast %12 : vector<2x32x1xf32> to vector<2x32x4xf32>
    %19 = vector.broadcast %17 : vector<1x32x4xf32> to vector<2x32x4xf32>
    %20 = arith.mulf %18, %19 : vector<2x32x4xf32>
    %cst_12 = arith.constant dense<0.000000e+00> : vector<2x4xf32>
    %21 = vector.multi_reduction <add>, %20, %cst_12 [1] : vector<2x32x4xf32> to vector<2x4xf32>
    %22 = vector.shape_cast %21 : vector<2x4xf32> to vector<2x1x4xf32>
    %cst_13 = arith.constant 0.000000e+00 : f32
    %23 = vector.broadcast %cst_13 : f32 to vector<2x1x4xf32>
    %24 = arith.maximumf %22, %23 : vector<2x1x4xf32>
    %25 = vector.shape_cast %16 : vector<32x4xf32> to vector<1x32x4xf32>
    %26 = vector.broadcast %24 : vector<2x1x4xf32> to vector<2x32x4xf32>
    %27 = vector.broadcast %25 : vector<1x32x4xf32> to vector<2x32x4xf32>
    %28 = arith.mulf %26, %27 : vector<2x32x4xf32>
    %cst_14 = arith.constant dense<0.000000e+00> : vector<2x32xf32>
    %29 = vector.multi_reduction <add>, %28, %cst_14 [2] : vector<2x32x4xf32> to vector<2x32xf32>
    %30 = vector.shape_cast %29 : vector<2x32xf32> to vector<2x32x1xf32>
    %31 = arith.negf %30 : vector<2x32x1xf32>
    %32 = math.exp %31 : vector<2x32x1xf32>
    %cst_15 = arith.constant 1.000000e+00 : f32
    %33 = vector.broadcast %cst_15 : f32 to vector<2x32x1xf32>
    %34 = arith.addf %33, %32 : vector<2x32x1xf32>
    %35 = arith.divf %33, %34 : vector<2x32x1xf32>
    %c0_16 = arith.constant 0 : index
    %c0_17 = arith.constant 0 : index
    %c0_18 = arith.constant 0 : index
    %36 = vector.load %arg5[%c0_16, %c0_17, %c0_18] : memref<2x32x1xf32, #tpu.memory_space<vmem>>, vector<2x32x1xf32>
    tpu.vector_store %arg5[%c0_16, %c0_17, %c0_18], %35 {strides = array<i32>} : memref<2x32x1xf32, #tpu.memory_space<vmem>>, vector<2x32x1xf32>,
    return
  }
  func.func @transform_0(%arg0: i32) -> (i32, i32, i32) {
    %c0_i32 = arith.constant 0 : i32
    %c0_i32_0 = arith.constant 0 : i32
    %c0_i32_1 = arith.constant 0 : i32
    %c0_i32_2 = arith.constant 0 : i32
    return %c0_i32, %c0_i32_0, %c0_i32_1 : i32, i32, i32
  }
  func.func @transform_1(%arg0: i32) -> (i32, i32) {
    %c0_i32 = arith.constant 0 : i32
    %c0_i32_0 = arith.constant 0 : i32
    %c0_i32_1 = arith.constant 0 : i32
    return %c0_i32, %c0_i32_0 : i32, i32
  }
  func.func @transform_2(%arg0: i32) -> (i32, i32) {
    %c0_i32 = arith.constant 0 : i32
    %c0_i32_0 = arith.constant 0 : i32
    %c0_i32_1 = arith.constant 0 : i32
    return %c0_i32, %c0_i32_0 : i32, i32
  }
  func.func @transform_3(%arg0: i32) -> (i32, i32, i32) {
    %c0_i32 = arith.constant 0 : i32
    %c0_i32_0 = arith.constant 0 : i32
    %c0_i32_1 = arith.constant 0 : i32
    %c0_i32_2 = arith.constant 0 : i32
    return %c0_i32, %c0_i32_0, %c0_i32_1 : i32, i32, i32
  }
  func.func @transform_4(%arg0: i32) -> (i32, i32, i32) {
    %c0_i32 = arith.constant 0 : i32
    %c0_i32_0 = arith.constant 0 : i32
    %c0_i32_1 = arith.constant 0 : i32
    %c0_i32_2 = arith.constant 0 : i32
    return %c0_i32, %c0_i32_0, %c0_i32_1 : i32, i32, i32
  }
}

</mosaic_0001>

<bundles_post_ra>
// kernel: tpu_custom_call.1
= control target key start
LH: loop header
LB: loop body
LE: loop exit
PB: predicated region body
PF: predicated region fallthrough
CT: control target
= control target key end

     0   :  { %9 = vsyncpa [#allocation3], 0  ;;  %s369_s15 = smov [#allocation2]   ;;  %s518_s0 = inlined_call_operand.hbm [shape: f32[2,32,256], index: 0, kind: input, shape index: {}]   ;;  %s519_s1 = inlined_call_operand.vmem [shape: f32[32,256], index: 1, kind: input, shape index: {}]   ;;  %s520_s2 = inlined_call_operand.vmem [shape: f32[32,1], index: 2, kind: input, shape index: {}]   ;;  %s521_s3 = inlined_call_operand.vmem [shape: f32[2,32,4], index: 3, kind: input, shape index: {}]   ;;  %s522_s4 = inlined_call_operand.vmem [shape: f32[2,32,1], index: 4, kind: output, shape index: {}]  }
   0x1   :  { %s15_s16 = sshll.u32 %s369_s15, 4  ;;  %s345_s19 = scalar_lea.hbm %s518_s0, 2048  ;;  %s16_s16 = int_to_ptr.vmem [resolvable:$true] %s15_s16 }
   0x2   :  { %p346_p0 = scmp.ne.s32.totalorder %s518_s0, %s345_s19  ;;  %p349_p1 = scmp.lt.u32.totalorder %s345_s19, %s518_s0 }
   0x4   :  { %p351_p2 = pnand %p349_p1, %p346_p0 }
   0x6   :  { %354 = shalt.err (!%p351_p2)
}
   0x7   :  { %s355_s24 = scalar_lea.vmem %s16_s16, 2048  ;;  %p360_p4 = scmp.lt.s32.totalorder %s16_s16, %s16_s16 }
   0x8   :  { %p356_p3 = scmp.ne.s32.totalorder %s16_s16, %s355_s24  ;;  %p361_p5 = scmp.lt.s32.totalorder %s355_s24, %s355_s24 }
   0xa   :  { %p362_p6 = por %p361_p5, %p360_p4 }
   0xc   :  { %p363_p7 = pnand %p362_p6, %p356_p3 }
   0xe   :  { %366 = shalt.err (!%p363_p7)
}
   0xf   :  { %s370_s25 = smov 256   ;;  %s371_s26 = smov 16  }
  0x10   :  { %21 = dma.hbm_to_vmem [thread:$0]  %s518_s0, 2048, %s16_s16, [#allocation3], %s370_s25, %s370_s25, %s371_s26  }
  0x11   :  { %367 = dma.done.wait [#allocation3], 2048  }
  0x12   :  { %368 = vsyncadd [#allocation3], 4294965248  ;;  %v31_v0 = vld [vmem:[#allocation2] sm:$0xff]  ;;  %v32_v1 = vld [vmem:[#allocation2 + $0x8] sm:$0xff]  ;;  %v372_v48 = vmov 0   ;;  %vm172_vm0 = vcmask 31744  }
  0x13   :  { %v47_v2 = vld [vmem:[%s519_s1] sm:$0xff]  ;;  %v48_v3 = vld [vmem:[%s519_s1 + $0x8] sm:$0xff]  ;;  %v33_v5 = vld [vmem:[#allocation2 + $0x10] sm:$0xff]  ;;  %311 = vset.pattern.permute.xlu0 %v372_v48  ;;  %312 = vset.pattern.permute.xlu1 %v372_v48  ;;  %vm281_vm1 = vcmask 7168  }
  0x14   :  { %v55_v4 = vmul.f32 %v47_v2, %v31_v0  ;;  %v34_v6 = vld [vmem:[#allocation2 + $0x18] sm:$0xff]  ;;  %v56_v7 = vmul.f32 %v48_v3, %v32_v1  ;;  %v49_v8 = vld [vmem:[%s519_s1 + $0x10] sm:$0xff]  ;;  %v39_v10 = vld [vmem:[#allocation2 + $0x40] sm:$0xff] }
  0x15   :  { %v50_v9 = vld [vmem:[%s519_s1 + $0x18] sm:$0xff]  ;;  %v57_v11 = vmul.f32 %v49_v8, %v33_v5  ;;  %v40_v13 = vld [vmem:[#allocation2 + $0x48] sm:$0xff]  ;;  %v63_v14 = vmul.f32 %v47_v2, %v39_v10  ;;  %v41_v15 = vld [vmem:[#allocation2 + $0x50] sm:$0xff] }
  0x16   :  { %v58_v12 = vmul.f32 %v50_v9, %v34_v6  ;;  %v42_v16 = vld [vmem:[#allocation2 + $0x58] sm:$0xff]  ;;  %v71_v17 = vadd.f32 %v56_v7, %v55_v4  ;;  %v64_v18 = vmul.f32 %v48_v3, %v40_v13  ;;  %v65_v19 = vmul.f32 %v49_v8, %v41_v15  ;;  %v35_v21 = vld [vmem:[#allocation2 + $0x20] sm:$0xff]  ;;  %v36_v22 = vld [vmem:[#allocation2 + $0x28] sm:$0xff] }
  0x17   :  { %v66_v20 = vmul.f32 %v50_v9, %v42_v16  ;;  %v51_v23 = vld [vmem:[%s519_s1 + $0x20] sm:$0xff]  ;;  %v52_v24 = vld [vmem:[%s519_s1 + $0x28] sm:$0xff]  ;;  %v37_v31 = vld [vmem:[#allocation2 + $0x30] sm:$0xff] }
  0x18   :  { %v43_v25 = vld [vmem:[#allocation2 + $0x60] sm:$0xff]  ;;  %v44_v26 = vld [vmem:[#allocation2 + $0x68] sm:$0xff]  ;;  %72 = vadd.xlane.f32.xlu0 %v71_v17  ;;  %v74_v27 = vadd.f32 %v58_v12, %v57_v11  ;;  %v83_v28 = vadd.f32 %v64_v18, %v63_v14  ;;  %v59_v29 = vmul.f32 %v51_v23, %v35_v21  ;;  %v60_v30 = vmul.f32 %v52_v24, %v36_v22  ;;  %v38_v32 = vld [vmem:[#allocation2 + $0x38] sm:$0xff] }
  0x19   :  { %v53_v33 = vld [vmem:[%s519_s1 + $0x30] sm:$0xff]  ;;  %v54_v34 = vld [vmem:[%s519_s1 + $0x38] sm:$0xff]  ;;  %v86_v35 = vadd.f32 %v66_v20, %v65_v19  ;;  %v67_v36 = vmul.f32 %v51_v23, %v43_v25  ;;  %v68_v37 = vmul.f32 %v52_v24, %v44_v26  ;;  %v95_v49 = vld [vmem:[%s520_s2] sm:$0xff] }
  0x1a   :  { %84 = vadd.xlane.f32.xlu1 %v83_v28  ;;  %v45_v38 = vld [vmem:[#allocation2 + $0x70] sm:$0xff]  ;;  %v46_v39 = vld [vmem:[#allocation2 + $0x78] sm:$0xff]  ;;  %v77_v40 = vadd.f32 %v60_v30, %v59_v29  ;;  %v61_v41 = vmul.f32 %v53_v33, %v37_v31  ;;  %v62_v42 = vmul.f32 %v54_v34, %v38_v32  ;;  %v96_v52 = vld [vmem:[%s520_s2 + $0x8] sm:$0xff] }
  0x1b   :  { %v89_v43 = vadd.f32 %v68_v37, %v67_v36  ;;  %v69_v44 = vmul.f32 %v53_v33, %v45_v38  ;;  %v70_v45 = vmul.f32 %v54_v34, %v46_v39  ;;  %v97_v62 = vld [vmem:[%s520_s2 + $0x10] sm:$0xff]  ;;  %v98_v5 = vld [vmem:[%s520_s2 + $0x18] sm:$0xff]  ;;  %v116_v16 = vld [vmem:[%s521_s3 + $0x8] sm:$0xff] }
  0x1c   :  { %75 = vadd.xlane.f32.xlu0 %v74_v27  ;;  %v80_v46 = vadd.f32 %v62_v42, %v61_v41  ;;  %v115_v17 = vld [vmem:[%s521_s3] sm:$0xff]  ;;  %v117_v19 = vld [vmem:[%s521_s3 + $0x10] sm:$0xff]  ;;  %v118_v27 = vld [vmem:[%s521_s3 + $0x18] sm:$0xff] }
  0x1d   :  { %v92_v47 = vadd.f32 %v70_v45, %v69_v44 }
  0x1e   :  { %87 = vadd.xlane.f32.xlu1 %v86_v35 }
  0x20   :  { %78 = vadd.xlane.f32.xlu0 %v77_v40 }
  0x22   :  { %90 = vadd.xlane.f32.xlu1 %v89_v43 }
  0x24   :  { %81 = vadd.xlane.f32.xlu0 %v80_v46 }
  0x26   :  { %93 = vadd.xlane.f32.xlu1 %v92_v47 }
  0xa5   :  { %v73_v50 = vpop.xlane.xlu0 %72 }
  0xa6   :  { %v99_v51 = vadd.f32 %v95_v49, %v73_v50 }
  0xa7   :  { %v85_v53 = vpop.xlane.xlu1 %84 }
  0xa8   :  { %v107_v54 = vmax.f32 %v99_v51, 0.0  ;;  %v103_v57 = vadd.f32 %v95_v49, %v85_v53 }
  0xa9   :  { %v76_v55 = vpop.xlane.xlu0 %75 }
  0xaa   :  { %v100_v56 = vadd.f32 %v96_v52, %v76_v55  ;;  %126 = vperm.xlu0 %311, %v107_v54   ;;  %v111_v60 = vmax.f32 %v103_v57, 0.0  ;;  %v296_v57 = vld [vmem:[%s521_s3 + $0x28] sm:$0xff] }
  0xab   :  { %v88_v58 = vpop.xlane.xlu1 %87 }
  0xac   :  { %v108_v59 = vmax.f32 %v100_v56, 0.0  ;;  %v104_v61 = vadd.f32 %v96_v52, %v88_v58  ;;  %v295_v58 = vld [vmem:[%s521_s3 + $0x20] sm:$0xff] }
  0xad   :  { %v79_v63 = vpop.xlane.xlu0 %78 }
  0xae   :  { %131 = vperm.xlu1 %312, %v108_v59   ;;  %v112_v0 = vmax.f32 %v104_v61, 0.0  ;;  %v101_v1 = vadd.f32 %v97_v62, %v79_v63  ;;  %v297_v61 = vld [vmem:[%s521_s3 + $0x30] sm:$0xff] }
  0xaf   :  { %v91_v2 = vpop.xlane.xlu1 %90 }
  0xb0   :  { %v109_v3 = vmax.f32 %v101_v1, 0.0  ;;  %v105_v4 = vadd.f32 %v97_v62, %v91_v2  ;;  %v298_v62 = vld [vmem:[%s521_s3 + $0x38] sm:$0xff] }
  0xb1   :  { %v82_v6 = vpop.xlane.xlu0 %81 }
  0xb2   :  { %146 = vperm.xlu1 %312, %v111_v60   ;;  %v113_v7 = vmax.f32 %v105_v4, 0.0  ;;  %v102_v8 = vadd.f32 %v98_v5, %v82_v6 }
  0xb3   :  { %v94_v9 = vpop.xlane.xlu1 %93 }
  0xb4   :  { %v110_v10 = vmax.f32 %v102_v8, 0.0  ;;  %v106_v11 = vadd.f32 %v98_v5, %v94_v9 }
  0xb6   :  { %151 = vperm.xlu1 %312, %v112_v0   ;;  %v114_v12 = vmax.f32 %v106_v11, 0.0 }
  0xba   :  { %136 = vperm.xlu1 %312, %v109_v3  }
  0xbe   :  { %156 = vperm.xlu1 %312, %v113_v7  }
  0xc2   :  { %141 = vperm.xlu1 %312, %v110_v10  }
  0xc6   :  { %161 = vperm.xlu1 %312, %v114_v12  }
 0x129   :  { %v127_v18 = vpop.permute.xlu0 %126 }
 0x12a   :  { %v164_v22 = vmul.f32 %v127_v18, %v115_v17 }
 0x12c   :  { %v173_v28 = vsel %vm172_vm0, %v164_v22, 0.0 }
 0x12d   :  { %v132_v13 = vpop.permute.xlu1 %131 }
 0x12e   :  { %v165_v21 = vmul.f32 %v132_v13, %v116_v16 }
 0x130   :  { %v174_v25 = vsel %vm172_vm0, %v165_v21, 0.0 }
 0x131   :  { %v147_v14 = vpop.permute.xlu1 %146  ;;  %v175_v32 = vadd.f32 %v174_v25, %v173_v28 }
 0x132   :  { %v168_v29 = vmul.f32 %v147_v14, %v115_v17 }
 0x134   :  { %v186_v37 = vsel %vm172_vm0, %v168_v29, 0.0 }
 0x135   :  { %v152_v15 = vpop.permute.xlu1 %151 }
 0x136   :  { %v169_v26 = vmul.f32 %v152_v15, %v116_v16 }
 0x138   :  { %v187_v34 = vsel %vm172_vm0, %v169_v26, 0.0 }
 0x139   :  { %v137_v20 = vpop.permute.xlu1 %136  ;;  %v188_v40 = vadd.f32 %v187_v34, %v186_v37 }
 0x13a   :  { %v166_v23 = vmul.f32 %v137_v20, %v117_v19 }
 0x13c   :  { %v176_v30 = vsel %vm172_vm0, %v166_v23, 0.0 }
 0x13d   :  { %v157_v24 = vpop.permute.xlu1 %156  ;;  %v177_v36 = vadd.f32 %v176_v30, %v175_v32 }
 0x13e   :  { %v170_v31 = vmul.f32 %v157_v24, %v117_v19 }
 0x140   :  { %v189_v38 = vsel %vm172_vm0, %v170_v31, 0.0 }
 0x141   :  { %v142_v33 = vpop.permute.xlu1 %141  ;;  %v190_v44 = vadd.f32 %v189_v38, %v188_v40 }
 0x142   :  { %v167_v35 = vmul.f32 %v142_v33, %v118_v27 }
 0x144   :  { %v178_v39 = vsel %vm172_vm0, %v167_v35, 0.0 }
 0x145   :  { %v179_v41 = vadd.f32 %v178_v39, %v177_v36  ;;  %v162_v42 = vpop.permute.xlu1 %161 }
 0x146   :  { %v171_v43 = vmul.f32 %v162_v42, %v118_v27 }
 0x147   :  { %v180_v45 = vrot.slane %v179_v41, 4 }
 0x148   :  { %v191_v46 = vsel %vm172_vm0, %v171_v43, 0.0 }
 0x149   :  { %v181_v47 = vadd.f32 %v180_v45, %v179_v41  ;;  %v192_v48 = vadd.f32 %v191_v46, %v190_v44 }
 0x14b   :  { %v182_v49 = vrot.slane %v181_v47, 2  ;;  %v193_v50 = vrot.slane %v192_v48, 4 }
 0x14d   :  { %v183_v51 = vadd.f32 %v182_v49, %v181_v47  ;;  %v194_v52 = vadd.f32 %v193_v50, %v192_v48 }
 0x14f   :  { %v184_v53 = vrot.slane %v183_v51, 1  ;;  %v195_v54 = vrot.slane %v194_v52, 2 }
 0x151   :  { %v185_v55 = vadd.f32 %v184_v53, %v183_v51  ;;  %v196_v56 = vadd.f32 %v195_v54, %v194_v52 }
 0x153   :  { %v199_v59 = vmax.f32 %v185_v55, 0.0  ;;  %v197_v60 = vrot.slane %v196_v56, 1 }
 0x155   :  { %v198_v63 = vadd.f32 %v197_v60, %v196_v56  ;;  %v202_v0 = vmul.f32 %v296_v57, %v199_v59  ;;  %v201_v1 = vmul.f32 %v295_v58, %v199_v59  ;;  %v203_v2 = vmul.f32 %v297_v61, %v199_v59 }
 0x156   :  { %v204_v6 = vmul.f32 %v298_v62, %v199_v59 }
 0x157   :  { %v200_v3 = vmax.f32 %v198_v63, 0.0  ;;  %v212_v4 = vsel %vm172_vm0, %v202_v0, 0.0  ;;  %v209_v5 = vsel %vm172_vm0, %v201_v1, 0.0  ;;  %v215_v7 = vsel %vm172_vm0, %v203_v2, 0.0 }
 0x158   :  { %213 = vadd.xlane.f32.xlu0 %v212_v4  ;;  %210 = vadd.xlane.f32.xlu1 %v209_v5  ;;  %v218_v8 = vsel %vm172_vm0, %v204_v6, 0.0 }
 0x159   :  { %v205_v9 = vmul.f32 %v295_v58, %v200_v3  ;;  %v206_v10 = vmul.f32 %v296_v57, %v200_v3  ;;  %v207_v13 = vmul.f32 %v297_v61, %v200_v3  ;;  %v208_v14 = vmul.f32 %v298_v62, %v200_v3 }
 0x15b   :  { %v221_v11 = vsel %vm172_vm0, %v205_v9, 0.0  ;;  %v224_v12 = vsel %vm172_vm0, %v206_v10, 0.0  ;;  %v227_v15 = vsel %vm172_vm0, %v207_v13, 0.0  ;;  %v230_v16 = vsel %vm172_vm0, %v208_v14, 0.0 }
 0x15c   :  { %216 = vadd.xlane.f32.xlu0 %v215_v7  ;;  %219 = vadd.xlane.f32.xlu1 %v218_v8 }
 0x160   :  { %222 = vadd.xlane.f32.xlu0 %v221_v11  ;;  %225 = vadd.xlane.f32.xlu1 %v224_v12 }
 0x164   :  { %228 = vadd.xlane.f32.xlu0 %v227_v15  ;;  %231 = vadd.xlane.f32.xlu1 %v230_v16 }
 0x1e5   :  { %v214_v17 = vpop.xlane.xlu0 %213  ;;  %v211_v18 = vpop.xlane.xlu1 %210 }
 0x1e6   :  { %v300_v19 = vmul.f32 -1.442695, %v214_v17  ;;  %v299_v20 = vmul.f32 -1.442695, %v211_v18 }
 0x1e8   :  { %313 = vpow2.f32 %v300_v19 }
 0x1e9   :  { %315 = vpow2.f32 %v299_v20  ;;  %v217_v21 = vpop.xlane.xlu0 %216  ;;  %v220_v22 = vpop.xlane.xlu1 %219 }
 0x1ea   :  { %v301_v23 = vmul.f32 -1.442695, %v217_v21  ;;  %v302_v24 = vmul.f32 -1.442695, %v220_v22 }
 0x1ec   :  { %317 = vpow2.f32 %v301_v23 }
 0x1ed   :  { %319 = vpow2.f32 %v302_v24  ;;  %v223_v25 = vpop.xlane.xlu0 %222  ;;  %v226_v26 = vpop.xlane.xlu1 %225 }
 0x1ee   :  { %v303_v27 = vmul.f32 -1.442695, %v223_v25  ;;  %v304_v28 = vmul.f32 -1.442695, %v226_v26 }
 0x1f0   :  { %321 = vpow2.f32 %v303_v27 }
 0x1f1   :  { %323 = vpow2.f32 %v304_v28  ;;  %v229_v29 = vpop.xlane.xlu0 %228  ;;  %v232_v30 = vpop.xlane.xlu1 %231 }
 0x1f2   :  { %v314_v31 = vpop.eup %313  ;;  %v305_v32 = vmul.f32 -1.442695, %v229_v29  ;;  %v306_v35 = vmul.f32 -1.442695, %v232_v30 }
 0x1f3   :  { %v316_v33 = vpop.eup %315  ;;  %v258_v34 = vadd.f32 1.0, %v314_v31 }
 0x1f4   :  { %v257_v36 = vadd.f32 1.0, %v316_v33  ;;  %325 = vpow2.f32 %v305_v32 }
 0x1f5   :  { %327 = vrcp.f32 %v258_v34 }
 0x1f6   :  { %v318_v37 = vpop.eup %317  ;;  %329 = vrcp.f32 %v257_v36 }
 0x1f7   :  { %v320_v38 = vpop.eup %319  ;;  %v259_v39 = vadd.f32 1.0, %v318_v37  ;;  %331 = vpow2.f32 %v306_v35 }
 0x1f8   :  { %v260_v40 = vadd.f32 1.0, %v320_v38 }
 0x1f9   :  { %333 = vrcp.f32 %v259_v39 }
 0x1fa   :  { %v322_v41 = vpop.eup %321  ;;  %335 = vrcp.f32 %v260_v40 }
 0x1fb   :  { %v324_v42 = vpop.eup %323  ;;  %v261_v43 = vadd.f32 1.0, %v322_v41 }
 0x1fc   :  { %v262_v44 = vadd.f32 1.0, %v324_v42 }
 0x1fd   :  { %337 = vrcp.f32 %v261_v43 }
 0x1fe   :  { %v326_v45 = vpop.eup %325  ;;  %339 = vrcp.f32 %v262_v44 }
 0x1ff   :  { %v328_v46 = vpop.eup %327  ;;  %v263_v47 = vadd.f32 1.0, %v326_v45 }
 0x200   :  { %v330_v48 = vpop.eup %329  ;;  %283 = vst.msk [vmem:[%s522_s4 + $0x8] sm:$0xff] %vm281_vm1, %v328_v46 }
 0x201   :  { %v332_v49 = vpop.eup %331  ;;  %282 = vst.msk [vmem:[%s522_s4] sm:$0xff] %vm281_vm1, %v330_v48  ;;  %341 = vrcp.f32 %v263_v47 }
 0x202   :  { %v264_v50 = vadd.f32 1.0, %v332_v49 }
 0x203   :  { %v334_v51 = vpop.eup %333 }
 0x204   :  { %v336_v52 = vpop.eup %335  ;;  %284 = vst.msk [vmem:[%s522_s4 + $0x10] sm:$0xff] %vm281_vm1, %v334_v51  ;;  %343 = vrcp.f32 %v264_v50 }
 0x205   :  { %285 = vst.msk [vmem:[%s522_s4 + $0x18] sm:$0xff] %vm281_vm1, %v336_v52 }
 0x207   :  { %v338_v53 = vpop.eup %337 }
 0x208   :  { %v340_v54 = vpop.eup %339  ;;  %286 = vst.msk [vmem:[%s522_s4 + $0x20] sm:$0xff] %vm281_vm1, %v338_v53 }
 0x209   :  { %287 = vst.msk [vmem:[%s522_s4 + $0x28] sm:$0xff] %vm281_vm1, %v340_v54 }
 0x20b   :  { %v342_v55 = vpop.eup %341 }
 0x20c   :  { %288 = vst.msk [vmem:[%s522_s4 + $0x30] sm:$0xff] %vm281_vm1, %v342_v55 }
 0x20e   :  { %v344_v56 = vpop.eup %343 }
 0x20f   :  { %289 = vst.msk [vmem:[%s522_s4 + $0x38] sm:$0xff] %vm281_vm1, %v344_v56 }
 0x210   :  { %294 = vsyncpa [#allocation3], 1 }

</bundles_post_ra>
